<compile_context>
chip_gen: v7x
topology: tpu7x:2x2x1
jax: 0.10.0
libtpu: 0.0.40
codegen_flags: <defaults>
</compile_context>

<pallas_src>
import functools

import jax
import jax.numpy as jnp
from jax.experimental import pallas as pl
from jax.experimental.pallas import tpu as pltpu


def _round_up(x, m):
    return ((x + m - 1) // m) * m


def _alpha_embed_kernel(num_actions, num_rewards, out_pad,
                        obs_ref, ri_ref,              # (TB, O), (TB, R)
                        wo_ref, bo_ref,               # (O, H), (1, H)
                        wa_ref, ba_ref,               # (R, H), (1, H)
                        wh_ref, bh_ref,               # (H, A+R), (1, A+R) fused head|value
                        out_ref):                     # (TB, out_pad) packed lane-dense slab
    # Body: two tiny MXU dots, sigmoid (EUP/VPU), elementwise product.
    obs_lin = jnp.dot(obs_ref[...], wo_ref[...],
                      preferred_element_type=jnp.float32) + bo_ref[...]
    alpha_lin = jnp.dot(ri_ref[...], wa_ref[...],
                        preferred_element_type=jnp.float32) + ba_ref[...]
    x = jax.nn.sigmoid(obs_lin) * jax.nn.sigmoid(alpha_lin)            # (TB, H)

    # Fused heads: one MXU dot -> [logits | value].
    hv = jnp.dot(x, wh_ref[...], preferred_element_type=jnp.float32) + bh_ref[...]
    logits = hv[:, :num_actions]                                       # (TB, A)
    value = hv[:, num_actions:]                                        # (TB, R)

    # log_softmax / softmax, reusing exp once.
    m = jnp.max(logits, axis=-1, keepdims=True)
    shifted = logits - m
    p = jnp.exp(shifted)
    sumexp = jnp.sum(p, axis=-1, keepdims=True)
    log_sumexp = jnp.log(sumexp)
    logprob = shifted - log_sumexp
    prob = p / sumexp

    # check_prob numeric fallback: softmax output is nonnegative and finite unless the
    # logsumexp is non-finite, so a single (TB, 1) check suffices.
    bad_rows = ~jnp.isfinite(m + log_sumexp)                           # (TB, 1)
    uniform = jnp.float32(1.0 / num_actions)
    prob = jnp.where(bad_rows, uniform, prob)
    logprob = jnp.where(bad_rows, jnp.log(uniform), logprob)

    # Pack into one lane-dense output slab: [logprob | prob | value | zeros].
    tb = obs_ref.shape[0]
    pad_cols = out_pad - (2 * num_actions + num_rewards)
    parts = [logprob, prob, value]
    if pad_cols > 0:
        parts.append(jnp.zeros((tb, pad_cols), jnp.float32))
    out_ref[...] = jnp.concatenate(parts, axis=-1)


def prepare_params(params):
    """One-time packaging of weights into kernel-ready tensors (do NOT call per step)."""
    return dict(
        w_obs=params["w_obs"].astype(jnp.float32),                      # (O, H)
        b_obs=params["b_obs"].astype(jnp.float32)[None, :],             # (1, H)
        w_alpha=params["w_alpha"].astype(jnp.float32),                  # (R, H)
        b_alpha=params["b_alpha"].astype(jnp.float32)[None, :],         # (1, H)
        w_hv=jnp.concatenate([params["w_head"], params["w_value"]],
                             axis=1).astype(jnp.float32),               # (H, A+R)
        b_hv=jnp.concatenate([params["b_head"], params["b_value"]]
                             )[None, :].astype(jnp.float32),            # (1, A+R)
    )


def _choose_block_b(B):
    # Big tiles amortize the ~0.35 us per-grid-step overhead; keep >=2 grid steps when
    # the batch is large so both v7x TensorCores get work (costs ~nothing on v5e/v6e).
    bb = min(4096, _round_up(B, 8))
    if B > 1024:
        bb = min(bb, _round_up(pl.cdiv(_round_up(B, 8), 2), 8))
    return bb


def alpha_embed_policy_forward_packed(obs, reward_importance, fused_params, *,
                                      block_b=None):
    """Fused forward; returns (slab, (A, R)) where slab is the lane-dense (B_pad, 128)
    array with columns [logprob(A) | prob(A) | value(R) | zero-pad]."""
    assert obs.ndim == 2 and reward_importance.ndim == 2
    B, O = obs.shape
    R = reward_importance.shape[1]

    wo, bo = fused_params["w_obs"], fused_params["b_obs"]
    wa, ba = fused_params["w_alpha"], fused_params["b_alpha"]
    wh, bh = fused_params["w_hv"], fused_params["b_hv"]
    H = wo.shape[1]
    A = wh.shape[1] - R

    out_width = 2 * A + R
    out_pad = _round_up(max(out_width, 128), 128)                       # lane-dense slab

    if block_b is None:
        block_b = _choose_block_b(B)
    block_b = max(8, _round_up(block_b, 8))
    b_pad = _round_up(B, block_b)

    obs_f = obs.astype(jnp.float32)
    ri_f = reward_importance.astype(jnp.float32)
    if b_pad != B:
        # Padded rows are zeros -> finite network outputs, cropped after the kernel.
        obs_f = jnp.pad(obs_f, ((0, b_pad - B), (0, 0)))
        ri_f = jnp.pad(ri_f, ((0, b_pad - B), (0, 0)))

    kernel = functools.partial(_alpha_embed_kernel, A, R, out_pad)

    # VMEM sizing: double-buffered in/out tiles + resident weights (only matters if a
    # caller forces a huge block_b; default 4096-row tiles stay well under 16 MiB).
    step_bytes = 4 * block_b * (O + R + out_pad)
    weight_bytes = 4 * (wo.size + bo.size + wa.size + ba.size + wh.size + bh.size)
    vmem_needed = 2 * step_bytes + 2 * weight_bytes + (2 << 20)
    vmem_limit = (int(min(max(vmem_needed, 16 << 20), 60 << 20))
                  if vmem_needed > (14 << 20) else None)

    slab = pl.pallas_call(
        kernel,
        out_shape=jax.ShapeDtypeStruct((b_pad, out_pad), jnp.float32),
        grid_spec=pltpu.PrefetchScalarGridSpec(
            num_scalar_prefetch=0,
            grid=(b_pad // block_b,),
            in_specs=[
                pl.BlockSpec((block_b, O), lambda i: (i, 0)),   # obs: batch-tiled
                pl.BlockSpec((block_b, R), lambda i: (i, 0)),   # reward_importance
                pl.BlockSpec((O, H), lambda i: (0, 0)),         # weights: resident
                pl.BlockSpec((1, H), lambda i: (0, 0)),
                pl.BlockSpec((R, H), lambda i: (0, 0)),
                pl.BlockSpec((1, H), lambda i: (0, 0)),
                pl.BlockSpec((H, A + R), lambda i: (0, 0)),
                pl.BlockSpec((1, A + R), lambda i: (0, 0)),
            ],
            out_specs=pl.BlockSpec((block_b, out_pad), lambda i: (i, 0)),
        ),
        compiler_params=pltpu.CompilerParams(
            dimension_semantics=("parallel",),
            vmem_limit_bytes=vmem_limit),
    )(obs_f, ri_f, wo, bo, wa, ba, wh, bh)
    return slab, (A, R)


def alpha_embed_policy_forward(obs, reward_importance, fused_params, *, block_b=None):
    """Convenience wrapper returning (logprob, prob, predicted_value).
    Traffic-sensitive consumers should use alpha_embed_policy_forward_packed and
    consume the slab directly instead of paying for these three slices."""
    squeeze = False
    if obs.ndim == 1:                          # mirror handle_batch_dim
        obs = obs[None, :]
        reward_importance = reward_importance[None, :]
        squeeze = True
    B = obs.shape[0]
    slab, (A, R) = alpha_embed_policy_forward_packed(
        obs, reward_importance, fused_params, block_b=block_b)
    logprob = slab[:B, :A]
    prob = slab[:B, A:2 * A]
    value = slab[:B, 2 * A:2 * A + R]
    if squeeze:
        logprob, prob, value = logprob[0], prob[0], value[0]
    return logprob, prob, value


def init_params(key, num_obs, num_hidden, num_actions, num_rewards):
    # Weights stored already transposed for `x @ W` (equivalent to nn.Linear weight.T).
    ks = jax.random.split(key, 8)
    s = 0.1
    return dict(
        w_obs=s * jax.random.normal(ks[0], (num_obs, num_hidden), jnp.float32),
        b_obs=s * jax.random.normal(ks[1], (num_hidden,), jnp.float32),
        w_alpha=s * jax.random.normal(ks[2], (num_rewards, num_hidden), jnp.float32),
        b_alpha=s * jax.random.normal(ks[3], (num_hidden,), jnp.float32),
        w_head=s * jax.random.normal(ks[4], (num_hidden, num_actions), jnp.float32),
        b_head=s * jax.random.normal(ks[5], (num_actions,), jnp.float32),
        w_value=s * jax.random.normal(ks[6], (num_hidden, num_rewards), jnp.float32),
        b_value=s * jax.random.normal(ks[7], (num_rewards,), jnp.float32),
    )


def _reference_forward(obs, ri, p):
    # Pure-JAX mirror of AlphaEmbedPolicy.forward with default flags.
    obs_embed = jax.nn.sigmoid(obs @ p["w_obs"] + p["b_obs"])
    alpha_embed = jax.nn.sigmoid(ri @ p["w_alpha"] + p["b_alpha"])
    x = obs_embed * alpha_embed
    logits = x @ p["w_head"] + p["b_head"]
    logprob = jax.nn.log_softmax(logits, axis=-1)
    prob = jnp.exp(logprob)
    value = x @ p["w_value"] + p["b_value"]
    return logprob, prob, value


if __name__ == "__main__":
    num_obs, num_hidden, num_actions, num_rewards, batch = 16, 32, 8, 4, 8

    key = jax.random.PRNGKey(0)
    k_obs, k_ri, k_params = jax.random.split(key, 3)

    obs = jax.random.normal(k_obs, (batch, num_obs), jnp.float32)
    reward_importance = jax.nn.softmax(
        jax.random.normal(k_ri, (batch, num_rewards), jnp.float32), axis=-1)
    params = init_params(k_params, num_obs, num_hidden, num_actions, num_rewards)
    fused = prepare_params(params)   # one-time; reuse across forward calls

    logprob, prob, value = alpha_embed_policy_forward(obs, reward_importance, fused)
    jax.block_until_ready((logprob, prob, value))

    ref_logprob, ref_prob, ref_value = _reference_forward(obs, reward_importance, params)
    assert jnp.allclose(logprob, ref_logprob, atol=1e-5), "logprob mismatch"
    assert jnp.allclose(prob, ref_prob, atol=1e-5), "prob mismatch"
    assert jnp.allclose(value, ref_value, atol=1e-5), "value mismatch"

    # TODO(synk): check_prob's logger.warning side effects are not reproduced in-kernel;
    # only its numeric fallback (uniform probs for non-finite rows) is implemented.
    print("KERNEL_OK")
</pallas_src>

<mosaic_0001>
module attributes {stable_mosaic.version = 11 : i64} {
  func.func @_alpha_embed_kernel(%arg0: i32, %arg1: memref<8x16xf32, #tpu.memory_space<vmem>>, %arg2: memref<8x4xf32, #tpu.memory_space<vmem>>, %arg3: memref<16x32xf32, #tpu.memory_space<vmem>>, %arg4: memref<1x32xf32, #tpu.memory_space<vmem>>, %arg5: memref<4x32xf32, #tpu.memory_space<vmem>>, %arg6: memref<1x32xf32, #tpu.memory_space<vmem>>, %arg7: memref<32x12xf32, #tpu.memory_space<vmem>>, %arg8: memref<1x12xf32, #tpu.memory_space<vmem>>, %arg9: memref<8x128xf32, #tpu.memory_space<vmem>>) attributes {dimension_semantics = [#tpu.dimension_semantics<parallel>], iteration_bounds = array<i64: 1>, scalar_prefetch = 0 : i64, scratch_operands = 0 : i64, tpu.core_type = #tpu.core_type<tc>, window_params = [{transform_indices = @transform_0, window_bounds = array<i64: 8, 16>}, {transform_indices = @transform_1, window_bounds = array<i64: 8, 4>}, {pipeline_mode = #tpu.pipeline_mode<synchronous>, transform_indices = @transform_2, window_bounds = array<i64: 16, 32>}, {pipeline_mode = #tpu.pipeline_mode<synchronous>, transform_indices = @transform_3, window_bounds = array<i64: 1, 32>}, {pipeline_mode = #tpu.pipeline_mode<synchronous>, transform_indices = @transform_4, window_bounds = array<i64: 4, 32>}, {pipeline_mode = #tpu.pipeline_mode<synchronous>, transform_indices = @transform_5, window_bounds = array<i64: 1, 32>}, {pipeline_mode = #tpu.pipeline_mode<synchronous>, transform_indices = @transform_6, window_bounds = array<i64: 32, 12>}, {pipeline_mode = #tpu.pipeline_mode<synchronous>, transform_indices = @transform_7, window_bounds = array<i64: 1, 12>}, {transform_indices = @transform_8, window_bounds = array<i64: 8, 128>}]} {
    %c0 = arith.constant 0 : index
    %c0_0 = arith.constant 0 : index
    %0 = vector.load %arg1[%c0, %c0_0] : memref<8x16xf32, #tpu.memory_space<vmem>>, vector<8x16xf32>
    %c0_1 = arith.constant 0 : index
    %c0_2 = arith.constant 0 : index
    %1 = vector.load %arg3[%c0_1, %c0_2] : memref<16x32xf32, #tpu.memory_space<vmem>>, vector<16x32xf32>
    %cst = arith.constant dense<0.000000e+00> : vector<8x32xf32>
    %2 = tpu.matmul %0, %1, %cst {dimension_numbers = #tpu.dot_dimension_numbers<[1], [0], [0], [1], [0, 0, 1, 1], [], []>} : vector<8x16xf32>, vector<16x32xf32>, vector<8x32xf32> -> vector<8x32xf32>
    %c0_3 = arith.constant 0 : index
    %c0_4 = arith.constant 0 : index
    %3 = vector.load %arg4[%c0_3, %c0_4] : memref<1x32xf32, #tpu.memory_space<vmem>>, vector<1x32xf32>
    %4 = vector.broadcast %3 : vector<1x32xf32> to vector<8x32xf32>
    %5 = arith.addf %2, %4 : vector<8x32xf32>
    %c0_5 = arith.constant 0 : index
    %c0_6 = arith.constant 0 : index
    %6 = vector.load %arg2[%c0_5, %c0_6] : memref<8x4xf32, #tpu.memory_space<vmem>>, vector<8x4xf32>
    %c0_7 = arith.constant 0 : index
    %c0_8 = arith.constant 0 : index
    %7 = vector.load %arg5[%c0_7, %c0_8] : memref<4x32xf32, #tpu.memory_space<vmem>>, vector<4x32xf32>
    %cst_9 = arith.constant dense<0.000000e+00> : vector<8x32xf32>
    %8 = tpu.matmul %6, %7, %cst_9 {dimension_numbers = #tpu.dot_dimension_numbers<[1], [0], [0], [1], [0, 0, 1, 1], [], []>} : vector<8x4xf32>, vector<4x32xf32>, vector<8x32xf32> -> vector<8x32xf32>
    %c0_10 = arith.constant 0 : index
    %c0_11 = arith.constant 0 : index
    %9 = vector.load %arg6[%c0_10, %c0_11] : memref<1x32xf32, #tpu.memory_space<vmem>>, vector<1x32xf32>
    %10 = vector.broadcast %9 : vector<1x32xf32> to vector<8x32xf32>
    %11 = arith.addf %8, %10 : vector<8x32xf32>
    %12 = arith.negf %5 : vector<8x32xf32>
    %13 = math.exp %12 : vector<8x32xf32>
    %cst_12 = arith.constant 1.000000e+00 : f32
    %14 = vector.broadcast %cst_12 : f32 to vector<8x32xf32>
    %15 = arith.addf %14, %13 : vector<8x32xf32>
    %16 = arith.divf %14, %15 : vector<8x32xf32>
    %17 = arith.negf %11 : vector<8x32xf32>
    %18 = math.exp %17 : vector<8x32xf32>
    %cst_13 = arith.constant 1.000000e+00 : f32
    %19 = vector.broadcast %cst_13 : f32 to vector<8x32xf32>
    %20 = arith.addf %19, %18 : vector<8x32xf32>
    %21 = arith.divf %19, %20 : vector<8x32xf32>
    %22 = arith.mulf %16, %21 : vector<8x32xf32>
    %c0_14 = arith.constant 0 : index
    %c0_15 = arith.constant 0 : index
    %23 = vector.load %arg7[%c0_14, %c0_15] : memref<32x12xf32, #tpu.memory_space<vmem>>, vector<32x12xf32>
    %cst_16 = arith.constant dense<0.000000e+00> : vector<8x12xf32>
    %24 = tpu.matmul %22, %23, %cst_16 {dimension_numbers = #tpu.dot_dimension_numbers<[1], [0], [0], [1], [0, 0, 1, 1], [], []>} : vector<8x32xf32>, vector<32x12xf32>, vector<8x12xf32> -> vector<8x12xf32>
    %c0_17 = arith.constant 0 : index
    %c0_18 = arith.constant 0 : index
    %25 = vector.load %arg8[%c0_17, %c0_18] : memref<1x12xf32, #tpu.memory_space<vmem>>, vector<1x12xf32>
    %26 = vector.broadcast %25 : vector<1x12xf32> to vector<8x12xf32>
    %27 = arith.addf %24, %26 : vector<8x12xf32>
    %28 = vector.extract_strided_slice %27 {offsets = [0, 0], sizes = [8, 8], strides = [1, 1]} : vector<8x12xf32> to vector<8x8xf32>
    %29 = vector.extract_strided_slice %27 {offsets = [0, 8], sizes = [8, 4], strides = [1, 1]} : vector<8x12xf32> to vector<8x4xf32>
    %cst_19 = arith.constant dense<0xFF800000> : vector<8xf32>
    %30 = vector.multi_reduction <maximumf>, %28, %cst_19 [1] : vector<8x8xf32> to vector<8xf32>
    %31 = vector.shape_cast %30 : vector<8xf32> to vector<8x1xf32>
    %32 = vector.broadcast %31 : vector<8x1xf32> to vector<8x8xf32>
    %33 = arith.subf %28, %32 : vector<8x8xf32>
    %34 = math.exp %33 : vector<8x8xf32>
    %cst_20 = arith.constant dense<0.000000e+00> : vector<8xf32>
    %35 = vector.multi_reduction <add>, %34, %cst_20 [1] : vector<8x8xf32> to vector<8xf32>
    %36 = vector.shape_cast %35 : vector<8xf32> to vector<8x1xf32>
    %37 = math.log %36 : vector<8x1xf32>
    %38 = vector.broadcast %37 : vector<8x1xf32> to vector<8x8xf32>
    %39 = arith.subf %33, %38 : vector<8x8xf32>
    %40 = vector.broadcast %36 : vector<8x1xf32> to vector<8x8xf32>
    %41 = arith.divf %34, %40 : vector<8x8xf32>
    %42 = arith.addf %31, %37 : vector<8x1xf32>
    %43 = tpu.weird %42 : vector<8x1xf32> -> vector<8x1xi1>
    %cst_21 = arith.constant dense<true> : vector<8x1xi1>
    %44 = arith.xori %43, %cst_21 : vector<8x1xi1>
    %cst_22 = arith.constant dense<true> : vector<8x1xi1>
    %45 = arith.xori %44, %cst_22 : vector<8x1xi1>
    %cst_23 = arith.constant 1.250000e-01 : f32
    %46 = vector.shape_cast %45 : vector<8x1xi1> to vector<8x1xi1>
    %47 = vector.broadcast %46 : vector<8x1xi1> to vector<8x8xi1>
    %48 = vector.broadcast %cst_23 : f32 to vector<8x8xf32>
    %49 = arith.select %47, %48, %41 : vector<8x8xi1>, vector<8x8xf32>
    %cst_24 = arith.constant 1.250000e-01 : f32
    %50 = math.log %cst_24 : f32
    %51 = vector.shape_cast %45 : vector<8x1xi1> to vector<8x1xi1>
    %52 = vector.broadcast %51 : vector<8x1xi1> to vector<8x8xi1>
    %53 = vector.broadcast %50 : f32 to vector<8x8xf32>
    %54 = arith.select %52, %53, %39 : vector<8x8xi1>, vector<8x8xf32>
    %cst_25 = arith.constant 0.000000e+00 : f32
    %55 = vector.broadcast %cst_25 : f32 to vector<8x108xf32>
    %56 = tpu.concatenate %54, %49, %29, %55 in 1 : vector<8x8xf32>, vector<8x8xf32>, vector<8x4xf32>, vector<8x108xf32> -> vector<8x128xf32>
    %c0_26 = arith.constant 0 : index
    %c0_27 = arith.constant 0 : index
    %57 = vector.load %arg9[%c0_26, %c0_27] : memref<8x128xf32, #tpu.memory_space<vmem>>, vector<8x128xf32>
    tpu.vector_store %arg9[%c0_26, %c0_27], %56 {strides = array<i32>} : memref<8x128xf32, #tpu.memory_space<vmem>>, vector<8x128xf32>,
    return
  }
  func.func @transform_0(%arg0: i32) -> (i32, i32) {
    %c0_i32 = arith.constant 0 : i32
    %c0_i32_0 = arith.constant 0 : i32
    return %arg0, %c0_i32 : i32, i32
  }
  func.func @transform_1(%arg0: i32) -> (i32, i32) {
    %c0_i32 = arith.constant 0 : i32
    %c0_i32_0 = arith.constant 0 : i32
    return %arg0, %c0_i32 : i32, i32
  }
  func.func @transform_2(%arg0: i32) -> (i32, i32) {
    %c0_i32 = arith.constant 0 : i32
    %c0_i32_0 = arith.constant 0 : i32
    %c0_i32_1 = arith.constant 0 : i32
    return %c0_i32, %c0_i32_0 : i32, i32
  }
  func.func @transform_3(%arg0: i32) -> (i32, i32) {
    %c0_i32 = arith.constant 0 : i32
    %c0_i32_0 = arith.constant 0 : i32
    %c0_i32_1 = arith.constant 0 : i32
    return %c0_i32, %c0_i32_0 : i32, i32
  }
  func.func @transform_4(%arg0: i32) -> (i32, i32) {
    %c0_i32 = arith.constant 0 : i32
    %c0_i32_0 = arith.constant 0 : i32
    %c0_i32_1 = arith.constant 0 : i32
    return %c0_i32, %c0_i32_0 : i32, i32
  }
  func.func @transform_5(%arg0: i32) -> (i32, i32) {
    %c0_i32 = arith.constant 0 : i32
    %c0_i32_0 = arith.constant 0 : i32
    %c0_i32_1 = arith.constant 0 : i32
    return %c0_i32, %c0_i32_0 : i32, i32
  }
  func.func @transform_6(%arg0: i32) -> (i32, i32) {
    %c0_i32 = arith.constant 0 : i32
    %c0_i32_0 = arith.constant 0 : i32
    %c0_i32_1 = arith.constant 0 : i32
    return %c0_i32, %c0_i32_0 : i32, i32
  }
  func.func @transform_7(%arg0: i32) -> (i32, i32) {
    %c0_i32 = arith.constant 0 : i32
    %c0_i32_0 = arith.constant 0 : i32
    %c0_i32_1 = arith.constant 0 : i32
    return %c0_i32, %c0_i32_0 : i32, i32
  }
  func.func @transform_8(%arg0: i32) -> (i32, i32) {
    %c0_i32 = arith.constant 0 : i32
    %c0_i32_0 = arith.constant 0 : i32
    return %arg0, %c0_i32 : i32, i32
  }
}

</mosaic_0001>

<bundles_post_ra>
// kernel: tpu_custom_call.1
= control target key start
LH: loop header
LB: loop body
LE: loop exit
PB: predicated region body
PF: predicated region fallthrough
CT: control target
= control target key end

     0   :  { %v441_v2 = vmov 0.0|0.0   ;;  %vm442_vm0 = vmmov 0   ;;  %v443_v4 = vmov 0.0   ;;  %s544_s0 = inlined_call_operand.vmem [shape: f32[8,16], index: 0, kind: input, shape index: {}]   ;;  %s545_s1 = inlined_call_operand.vmem [shape: f32[8,4], index: 1, kind: input, shape index: {}]   ;;  %s546_s2 = inlined_call_operand.vmem [shape: f32[16,32], index: 2, kind: input, shape index: {}]   ;;  %s547_s3 = inlined_call_operand.vmem [shape: f32[1,32], index: 3, kind: input, shape index: {}]   ;;  %s548_s4 = inlined_call_operand.vmem [shape: f32[4,32], index: 4, kind: input, shape index: {}]   ;;  %s549_s5 = inlined_call_operand.vmem [shape: f32[1,32], index: 5, kind: input, shape index: {}]   ;;  %s550_s6 = inlined_call_operand.vmem [shape: f32[32,12], index: 6, kind: input, shape index: {}]   ;;  %s551_s7 = inlined_call_operand.vmem [shape: f32[1,12], index: 7, kind: input, shape index: {}]   ;;  %s552_s8 = inlined_call_operand.hbm [shape: f32[8,128], index: 8, kind: output, shape index: {}]  }
   0x1   :  { %v31_v0 = vld [vmem:[%s546_s2] sm:$0xff]  ;;  %v32_v1 = vld [vmem:[%s546_s2 + $0x8] sm:$0xff]  ;;  %389 = vmatprep.subr.bf16.mxu0 %v441_v2  ;;  %370 = vmatprep.mubr.msk.f32.mxu0 %vm442_vm0, %v443_v4 }
   0x2   :  { %v390_v3 = vpack.c.bf16 %v32_v1, %v31_v0  ;;  %392 = vmatprep.subr.bf16.mxu1 %v441_v2  ;;  %386 = vmatprep.mubr.msk.f32.mxu1 %vm442_vm0, %v443_v4 }
   0x3   :  { %13 = vsyncpa [#allocation3], 0  ;;  %v30_v5 = vld [vmem:[%s544_s0] sm:$0xff]  ;;  %vm40_vm1 = vcmask 130048   ;;  %vm127_vm2 = vcmask 1043456   ;;  %vm123_vm3 = vcmask 31744  }
   0x4   :  { %391 = vmatpush3.bf16.msra.mxu0 %v390_v3  ;;  %v115_v6 = vld [vmem:[%s548_s4] sm:$0xf]  ;;  %v215_v9 = vld [vmem:[%s550_s6 + $0x8] sm:$0xff]  ;;  %v216_v10 = vld [vmem:[%s550_s6 + $0x10] sm:$0xff]  ;;  %vm225_vm4 = vcmask 261120   ;;  %vm299_vm5 = vcmask 64512  }
   0x5   :  { %373 = vmatprep.subr.mxu0 %v443_v4  ;;  %v114_v7 = vld [vmem:[%s545_s1] sm:$0xff]  ;;  %v217_v12 = vld [vmem:[%s550_s6 + $0x18] sm:$0xff]  ;;  %vm330_vm7 = vcmask 162816  }
   0x6   :  { %v214_v8 = vld [vmem:[%s550_s6] sm:$0xff]  ;;  %v396_v13 = vpack.c.bf16 %v217_v12, %v216_v10  ;;  %s444_s6 = smov 8  }
   0x7   :  { %371 = vmatmul.mubr.msk.f32.vlgmr.msra.gmra.mrb[0].mxu0 %vm40_vm1, %v30_v5  ;;  %v393_v11 = vpack.c.bf16 %v215_v9, %v214_v8  ;;  %v347_v14 = vld [vmem:[%s547_s3] ss:$0 sm:$0xff] }
   0x8   :  { %374 = vmatpush3.msk.msra.mxu0 %vm127_vm2, %v115_v6  ;;  %375 = vmatprep.mubr.msk.f32.mxu0 %vm442_vm0, %v443_v4  ;;  %v349_v18 = vld [vmem:[%s549_s5] ss:$0 sm:$0xff] }
   0x9   :  { %394 = vmatpush3.bf16.msra.mxu1 %v393_v11  ;;  %v354_v31 = vld [vmem:[%s551_s7] ss:$0 sm:$0xff]  ;;  %s445_s7 = smov [#allocation2]  }
   0xa   :  { %395 = vmatprep.subr.bf16.mxu1 %v441_v2  ;;  %s339_s23 = sshll.u32 %s445_s7, 4  ;;  %s340_s23 = int_to_ptr.vmem [resolvable:$true] %s339_s23 }
   0xb   :  { %376 = vmatmul.mubr.msk.f32.vlgmr.msra.gmra.mrb[2].mxu0 %vm123_vm3, %v114_v7  ;;  %s417_s24 = scalar_lea.vmem %s340_s23, 128  ;;  %p422_p1 = scmp.lt.s32.totalorder %s340_s23, %s340_s23 }
   0xc   :  { %p418_p0 = scmp.ne.s32.totalorder %s340_s23, %s417_s24  ;;  %p423_p2 = scmp.lt.s32.totalorder %s417_s24, %s417_s24 }
   0xd   :  { %397 = vmatpush3.bf16.msra.mxu1 %v396_v13 }
   0xe   :  { %p424_p3 = por %p423_p2, %p422_p1 }
  0x10   :  { %p425_p4 = pnand %p424_p3, %p418_p0 }
  0xda   :  { %v110_v15 = vpop.f32.mrb[0].mxu0 }
  0xdb   :  { %v111_v16 = vadd.f32 %v347_v14, %v110_v15  ;;  %v372_v17 = vpop.f32.mrb[1].mxu0 }
  0xdd   :  { %v352_v19 = vmul.f32 -1.442695, %v111_v16 }
  0xde   :  { %v197_v20 = vpop.f32.mrb[2].mxu0 }
  0xdf   :  { %403 = vpow2.f32 %v352_v19  ;;  %v198_v21 = vadd.f32 %v349_v18, %v197_v20  ;;  %v377_v22 = vpop.f32.mrb[3].mxu0 }
  0xe1   :  { %v353_v23 = vmul.f32 -1.442695, %v198_v21 }
  0xe3   :  { %405 = vpow2.f32 %v353_v23 }
  0xe9   :  { %v404_v24 = vpop.eup %403 }
  0xea   :  { %v204_v25 = vadd.f32 1.0, %v404_v24 }
  0xec   :  { %407 = vrcp.f32 %v204_v25 }
  0xed   :  { %v406_v26 = vpop.eup %405 }
  0xee   :  { %v210_v27 = vadd.f32 1.0, %v406_v26 }
  0xf0   :  { %409 = vrcp.f32 %v210_v27 }
  0xf6   :  { %v408_v28 = vpop.eup %407 }
  0xfa   :  { %v410_v29 = vpop.eup %409 }
  0xfb   :  { %v213_v30 = vmul.f32 %v410_v29, %v408_v28 }
  0xfd   :  { %387 = vmatmul.mubr.msk.f32.vlgmr.msra.gmra.mrb[0].mxu1 %vm225_vm4, %v213_v30 }
 0x1d0   :  { %v295_v32 = vpop.f32.mrb[0].mxu1 }
 0x1d1   :  { %v296_v33 = vadd.f32 %v354_v31, %v295_v32  ;;  %v388_v34 = vpop.f32.mrb[1].mxu1 }
 0x1d3   :  { %v300_v35 = vsel %vm299_vm5, %v296_v33, -inf }
 0x1d4   :  { %301 = vmax.xlane.f32.xlu0 %v300_v35 }
 0x261   :  { %v302_v36 = vpop.xlane.xlu0 %301 }
 0x262   :  { %v303_v37 = vsub.f32 %v296_v33, %v302_v36 }
 0x264   :  { %v304_v38 = vmul.f32 1.442695, %v303_v37 }
 0x266   :  { %411 = vpow2.f32 %v304_v38 }
 0x270   :  { %v412_v39 = vpop.eup %411 }
 0x271   :  { %v306_v40 = vsel %vm299_vm5, %v412_v39, 0.0 }
 0x272   :  { %307 = vadd.xlane.f32.xlu0 %v306_v40 }
 0x2ff   :  { %v308_v41 = vpop.xlane.xlu0 %307 }
 0x300   :  { %413 = vlog2.f32 %v308_v41 }
 0x301   :  { %415 = vrcp.f32 %v308_v41 }
 0x30a   :  { %v414_v42 = vpop.eup %413 }
 0x30b   :  { %v416_v43 = vpop.eup %415  ;;  %v310_v44 = vmul.f32 0.6931472, %v414_v42 }
 0x30c   :  { %v313_v47 = vmul.f32 %v416_v43, %v412_v39 }
 0x30d   :  { %v314_v45 = vadd.f32 %v310_v44, %v302_v36  ;;  %v311_v46 = vsub.f32 %v303_v37, %v310_v44 }
 0x30f   :  { %vm315_vm6 = vweird.f32 %v314_v45 }
 0x310   :  { %v318_v48 = vsel %vm315_vm6, 0.125, %v313_v47  ;;  %v319_v49 = vsel %vm315_vm6, -2.0794415, %v311_v46 }
 0x311   :  { %321 = vrot.lane.b32.xlu1 %v318_v48, %s444_s6 }
 0x315   :  { %325 = vrot.lane.b32.xlu1 %v296_v33, %s444_s6 }
 0x383   :  { %v322_v50 = vpop.permute.xlu1 %321 }
 0x384   :  { %v328_v51 = vsel %vm299_vm5, %v319_v49, %v322_v50 }
 0x387   :  { %v326_v52 = vpop.permute.xlu1 %325 }
 0x388   :  { %v329_v53 = vsel %vm40_vm1, %v328_v51, %v326_v52 }
 0x389   :  { %v331_v54 = vsel %vm330_vm7, %v329_v53, 0.0 }
 0x38a   :  { %332 = vst [vmem:[#allocation2] sm:$0xff] %v331_v54 }
 0x38b   :  { %428 = shalt.err (!%p425_p4)
}
 0x38c   :  { %s429_s27 = scalar_lea.hbm %s552_s8, 128 }
 0x38d   :  { %p430_p5 = scmp.ne.s32.totalorder %s552_s8, %s429_s27  ;;  %p433_p6 = scmp.lt.u32.totalorder %s429_s27, %s552_s8 }
 0x38f   :  { %p435_p7 = pnand %p433_p6, %p430_p5 }
 0x391   :  { %438 = shalt.err (!%p435_p7)
}
 0x392   :  { %342 = dma.vmem_to_hbm [thread:$0]  %s340_s23, 128, %s552_s8, [#allocation3]  }
 0x393   :  { %439 = dma.done.wait [#allocation3], 128  }
 0x394   :  { %440 = vsyncadd [#allocation3], 4294967168 }
 0x395   :  { %346 = vsyncpa [#allocation3], 1 }

</bundles_post_ra>
